<compile_context>
chip_gen: v5e
topology: v5e:2x2
jax: 0.10.0
libtpu: 0.0.40
codegen_flags: <defaults>
</compile_context>

<pallas_src>
import functools

import jax
import jax.numpy as jnp
from jax.experimental import pallas as pl
from jax.experimental.pallas import tpu as pltpu

_NEG_INF = -9e15  # exact masking constant used by the PyTorch reference


def _round_up(v, m):
    return ((v + m - 1) // m) * m


def _pick_row_tile(n):
    # int8 adjacency tiles need a sublane extent >= 32 (int8 packs (32,128));
    # a full-array block is always legal, so fall back to n.  128 keeps the
    # grid length >= 2 for N >= 256 so both v7x TensorCores get work; the
    # extra grid step on v5e/v6e costs ~0.35 us.
    for t in (128, 64, 32):
        if n % t == 0:
            return t
    return n


# ---------------------------------------------------------------------------
# Kernel 1: shared first-layer projection (run once for the whole graph)
# ---------------------------------------------------------------------------
def _project_kernel(x_ref, w_ref, a_ref, wh_ref, s1_ref, s2t_ref, *, nheads):
    """x_ref [N,F_in] f32, w_ref [F_in,Fp] f32 (cols >= H*nhid are zero),
    a_ref [Fp,2H] f32 (block-diag a1 | a2).  Outputs: wh [N,Fp] bf16,
    s1 [N,H] f32 (query scores), s2t [H,N] f32 (key scores, pre-transposed)."""
    wh = jnp.dot(x_ref[...].astype(jnp.bfloat16),
                 w_ref[...].astype(jnp.bfloat16),
                 preferred_element_type=jnp.float32)                    # [N, Fp]
    s = jnp.dot(wh, a_ref[...], preferred_element_type=jnp.float32)    # [N, 2H]
    wh_ref[...] = wh.astype(wh_ref.dtype)
    s1_ref[...] = s[:, :nheads]
    s2t_ref[...] = jnp.transpose(s[:, nheads:])                        # one XLU transpose


def gat_project(x, w_stack, a_stack, *, nheads):
    n, f_in = x.shape
    f_pad = w_stack.shape[1]
    flops = 2 * n * f_in * f_pad + 2 * n * f_pad * 2 * nheads
    bytes_accessed = (4 * (n * f_in + f_in * f_pad + f_pad * 2 * nheads)
                      + 2 * n * f_pad + 4 * n * 2 * nheads)
    kernel = functools.partial(_project_kernel, nheads=nheads)
    return pl.pallas_call(
        kernel,
        out_shape=(jax.ShapeDtypeStruct((n, f_pad), jnp.bfloat16),
                   jax.ShapeDtypeStruct((n, nheads), jnp.float32),
                   jax.ShapeDtypeStruct((nheads, n), jnp.float32)),
        grid=(1,),
        in_specs=[
            pl.BlockSpec((n, f_in), lambda i: (0, 0)),
            pl.BlockSpec((f_in, f_pad), lambda i: (0, 0)),
            pl.BlockSpec((f_pad, 2 * nheads), lambda i: (0, 0)),
        ],
        out_specs=(pl.BlockSpec((n, f_pad), lambda i: (0, 0)),
                   pl.BlockSpec((n, nheads), lambda i: (0, 0)),
                   pl.BlockSpec((nheads, n), lambda i: (0, 0))),
        compiler_params=pltpu.CompilerParams(
            dimension_semantics=("arbitrary",),
            vmem_limit_bytes=48 * 1024 * 1024),
        cost_estimate=pl.CostEstimate(flops=int(flops), transcendentals=0,
                                      bytes_accessed=int(bytes_accessed)),
    )(x, w_stack, a_stack)


# ---------------------------------------------------------------------------
# Kernel 2: all attention heads + fused out-layer projection, per row tile
# ---------------------------------------------------------------------------
def _heads_kernel(wh_ref, s1_ref, s2t_ref, adj_ref, wout_ref, aout_ref,
                  whf_ref, s1p_ref, s2pt_ref, *, alpha, nheads, nhid):
    """wh_ref [N,Fp] bf16 (key/value side, constant block)
       s1_ref [TQ,H] f32, s2t_ref [H,N] f32, adj_ref [TQ,N] int8
       wout_ref [Fp,Cp] bf16, aout_ref [Cp,2] f32
       outputs: whf [TQ,Cp] bf16, s1' [TQ,1] f32, s2'^T (1,TQ) block of [1,N]."""
    wh = wh_ref[...]                                        # [N, Fp] bf16
    s1 = s1_ref[...]                                        # [TQ, H]
    s2t = s2t_ref[...]                                      # [H, N]
    # Mask hoisted out of the head loop as an additive bias (one where per tile).
    bias = jnp.where(adj_ref[...] > 0, 0.0, _NEG_INF)       # [TQ, N] f32

    outs = []
    for h in range(nheads):
        e = s1[:, h:h + 1] + s2t[h:h + 1, :]                # [TQ, N]
        e = jnp.maximum(e, alpha * e) + bias                # LeakyReLU (0<alpha<1) + mask
        m = jnp.max(e, axis=1, keepdims=True)
        p = jnp.exp(e - m)
        att = p * pl.reciprocal(jnp.sum(p, axis=1, keepdims=True), approx=True)
        outs.append(jnp.dot(att.astype(jnp.bfloat16), wh[:, h * nhid:(h + 1) * nhid],
                            preferred_element_type=jnp.float32))        # [TQ, nhid]

    h_cat = jnp.concatenate(outs, axis=1)                   # [TQ, H*nhid]
    # ELU (alpha=1); exp-1 kept for Mosaic lowering compatibility (~1e-7 err).
    h_cat = jnp.where(h_cat > 0, h_cat, jnp.exp(h_cat) - 1.0)
    f_h = nheads * nhid
    f_pad = wout_ref.shape[0]
    if f_pad > f_h:                                         # lane-dense zero padding
        h_cat = jnp.concatenate(
            [h_cat, jnp.zeros((h_cat.shape[0], f_pad - f_h), h_cat.dtype)], axis=1)

    # Fused out-layer projection (row-wise): `hidden` never hits HBM.
    whf = jnp.dot(h_cat.astype(jnp.bfloat16), wout_ref[...],
                  preferred_element_type=jnp.float32)       # [TQ, Cp]
    sp = jnp.dot(whf, aout_ref[...], preferred_element_type=jnp.float32)  # [TQ, 2]
    whf_ref[...] = whf.astype(whf_ref.dtype)
    s1p_ref[...] = sp[:, 0:1]
    s2pt_ref[...] = jnp.transpose(sp[:, 1:2])               # [1, TQ]


def gat_heads(wh, s1, s2t, adj_mask, w_out_bf16, a_out, *, alpha, nheads, nhid):
    n, f_pad = wh.shape
    c_pad = w_out_bf16.shape[1]
    tq = _pick_row_tile(n)
    grid = (n // tq,)

    f_h = nheads * nhid
    flops = int(2 * n * n * f_h + 8 * nheads * n * n
                + 2 * n * f_pad * c_pad + 2 * n * c_pad * 2)
    transcendentals = int(nheads * n * n + n * f_h)
    bytes_accessed = int(2 * n * f_pad + 4 * n * nheads + 4 * nheads * n + n * n
                         + 2 * f_pad * c_pad + 4 * c_pad * 2
                         + 2 * n * c_pad + 4 * n + 4 * n)

    kernel = functools.partial(_heads_kernel, alpha=alpha, nheads=nheads, nhid=nhid)
    return pl.pallas_call(
        kernel,
        out_shape=(jax.ShapeDtypeStruct((n, c_pad), jnp.bfloat16),   # whf
                   jax.ShapeDtypeStruct((n, 1), jnp.float32),        # s1'
                   jax.ShapeDtypeStruct((1, n), jnp.float32)),       # s2'^T
        grid=grid,
        in_specs=[
            pl.BlockSpec((n, f_pad), lambda i: (0, 0)),          # wh, full (key/value)
            pl.BlockSpec((tq, nheads), lambda i: (i, 0)),        # query scores, row tile
            pl.BlockSpec((nheads, n), lambda i: (0, 0)),         # key scores, full
            pl.BlockSpec((tq, n), lambda i: (i, 0)),             # int8 adjacency rows
            pl.BlockSpec((f_pad, c_pad), lambda i: (0, 0)),      # W_out (bf16, padded)
            pl.BlockSpec((c_pad, 2), lambda i: (0, 0)),          # a_out (padded)
        ],
        out_specs=(pl.BlockSpec((tq, c_pad), lambda i: (i, 0)),
                   pl.BlockSpec((tq, 1), lambda i: (i, 0)),
                   pl.BlockSpec((1, tq), lambda i: (0, i))),
        compiler_params=pltpu.CompilerParams(
            dimension_semantics=("parallel",),
            vmem_limit_bytes=48 * 1024 * 1024),
        cost_estimate=pl.CostEstimate(flops=flops,
                                      transcendentals=transcendentals,
                                      bytes_accessed=bytes_accessed),
    )(wh, s1, s2t, adj_mask, w_out_bf16, a_out)


# ---------------------------------------------------------------------------
# Kernel 3: output attention layer + ELU + log_softmax, per row tile
# ---------------------------------------------------------------------------
def _out_attn_kernel(whf_ref, s1p_ref, s2pt_ref, adj_ref, out_ref, *, alpha, nclass):
    """whf_ref [N,Cp] bf16 (constant), s1p_ref [TQ,1] f32, s2pt_ref [1,N] f32,
    adj_ref [TQ,N] int8.  out_ref [TQ,Cp] f32 = log_softmax(elu(att @ whf))."""
    e = s1p_ref[...] + s2pt_ref[...]                         # [TQ, N]
    e = jnp.maximum(e, alpha * e)                            # LeakyReLU
    e = e + jnp.where(adj_ref[...] > 0, 0.0, _NEG_INF)       # mask bias
    m = jnp.max(e, axis=1, keepdims=True)
    p = jnp.exp(e - m)
    att = p * pl.reciprocal(jnp.sum(p, axis=1, keepdims=True), approx=True)
    out = jnp.dot(att.astype(jnp.bfloat16), whf_ref[...],
                  preferred_element_type=jnp.float32)        # [TQ, Cp]
    out = jnp.where(out > 0, out, jnp.exp(out) - 1.0)        # outer F.elu
    lane = jax.lax.broadcasted_iota(jnp.int32, out.shape, 1)
    out = jnp.where(lane < nclass, out, _NEG_INF)            # mask padded class lanes
    m2 = jnp.max(out, axis=1, keepdims=True)
    lse = jnp.log(jnp.sum(jnp.exp(out - m2), axis=1, keepdims=True)) + m2
    out_ref[...] = (out - lse).astype(out_ref.dtype)         # log_softmax


def gat_out_attention(whf, s1p, s2pt, adj_mask, *, alpha, nclass):
    n, c_pad = whf.shape
    tq = _pick_row_tile(n)
    grid = (n // tq,)

    flops = int(2 * n * n * c_pad + 8 * n * n + 6 * n * c_pad)
    transcendentals = int(n * n + 2 * n * c_pad)
    bytes_accessed = int(2 * n * c_pad + 4 * n + 4 * n + n * n + 4 * n * c_pad)

    kernel = functools.partial(_out_attn_kernel, alpha=alpha, nclass=nclass)
    return pl.pallas_call(
        kernel,
        out_shape=jax.ShapeDtypeStruct((n, c_pad), jnp.float32),
        grid=grid,
        in_specs=[
            pl.BlockSpec((n, c_pad), lambda i: (0, 0)),          # whf, full (value side)
            pl.BlockSpec((tq, 1), lambda i: (i, 0)),             # query scores
            pl.BlockSpec((1, n), lambda i: (0, 0)),              # key scores, full
            pl.BlockSpec((tq, n), lambda i: (i, 0)),             # int8 adjacency rows
        ],
        out_specs=pl.BlockSpec((tq, c_pad), lambda i: (i, 0)),
        compiler_params=pltpu.CompilerParams(
            dimension_semantics=("parallel",),
            vmem_limit_bytes=48 * 1024 * 1024),
        cost_estimate=pl.CostEstimate(flops=flops,
                                      transcendentals=transcendentals,
                                      bytes_accessed=bytes_accessed),
    )(whf, s1p, s2pt, adj_mask)


# ---------------------------------------------------------------------------
# Parameters, forward, reference
# ---------------------------------------------------------------------------
def init_gat_params(key, nfeat, nhid, nclass, nheads):
    """Xavier-uniform-like init (gain=1.414, as in pyGAT) + stacked/padded operands."""
    def xavier(k, shape):
        limit = 1.414 * jnp.sqrt(6.0 / (shape[0] + shape[1]))
        return jax.random.uniform(k, shape, jnp.float32, -limit, limit)

    keys = jax.random.split(key, 2 * nheads + 2)
    f_h = nheads * nhid
    f_pad = _round_up(f_h, 128)
    c_pad = _round_up(nclass, 128)

    heads = []
    w_stack = jnp.zeros((nfeat, f_pad), jnp.float32)
    a_stack = jnp.zeros((f_pad, 2 * nheads), jnp.float32)
    for h in range(nheads):
        W = xavier(keys[2 * h], (nfeat, nhid))
        a = xavier(keys[2 * h + 1], (2 * nhid, 1))
        heads.append((W, a))
        w_stack = w_stack.at[:, h * nhid:(h + 1) * nhid].set(W)
        a_stack = a_stack.at[h * nhid:(h + 1) * nhid, h].set(a[:nhid, 0])
        a_stack = a_stack.at[h * nhid:(h + 1) * nhid, nheads + h].set(a[nhid:, 0])

    W_out = xavier(keys[-2], (f_h, nclass))
    a_out = xavier(keys[-1], (2 * nclass, 1))
    w_out_pad = jnp.zeros((f_pad, c_pad), jnp.float32).at[:f_h, :nclass].set(W_out)
    a_out_pad = jnp.zeros((c_pad, 2), jnp.float32)
    a_out_pad = a_out_pad.at[:nclass, 0].set(a_out[:nclass, 0])
    a_out_pad = a_out_pad.at[:nclass, 1].set(a_out[nclass:, 0])

    return {"heads": heads, "out": (W_out, a_out),
            "w_stack": w_stack, "a_stack": a_stack,
            "w_out_pad_bf16": w_out_pad.astype(jnp.bfloat16),
            "a_out_pad": a_out_pad,
            "nheads": nheads, "nhid": nhid, "nclass": nclass}


def gat_forward(x, adj_mask, params, *, alpha):
    """GAT.forward in eval mode (F.dropout with training=False is identity).

    adj_mask: int8 (adj > 0) mask, precomputed ONCE per graph by the caller."""
    nheads, nhid, nclass = params["nheads"], params["nhid"], params["nclass"]
    wh, s1, s2t = gat_project(x, params["w_stack"], params["a_stack"], nheads=nheads)
    whf, s1p, s2pt = gat_heads(wh, s1, s2t, adj_mask,
                               params["w_out_pad_bf16"], params["a_out_pad"],
                               alpha=alpha, nheads=nheads, nhid=nhid)
    logp_pad = gat_out_attention(whf, s1p, s2pt, adj_mask, alpha=alpha, nclass=nclass)
    return logp_pad[:, :nclass]


def gat_reference(x, adj, params, *, alpha):
    """Pure-jnp f32 reference of the same forward, for a tolerance check."""
    def layer(xin, W, a, apply_elu):
        wh = xin @ W
        f = W.shape[1]
        e = wh @ a[:f] + (wh @ a[f:]).T
        e = jnp.where(e > 0, e, alpha * e)
        e = jnp.where(adj > 0, e, _NEG_INF)
        att = jax.nn.softmax(e, axis=1)
        hp = att @ wh
        return jnp.where(hp > 0, hp, jnp.expm1(hp)) if apply_elu else hp

    hs = [layer(x, W, a, True) for (W, a) in params["heads"]]
    xcat = jnp.concatenate(hs, axis=1)
    W_out, a_out = params["out"]
    out = layer(xcat, W_out, a_out, False)
    out = jnp.where(out > 0, out, jnp.expm1(out))
    return jax.nn.log_softmax(out, axis=1)


def symmetrize_adj(adj):
    """Module-level preprocessing from the reference file: adj <- max(adj, adj.T)."""
    a = adj.T * (adj.T > adj)
    b = adj * (adj.T > adj)
    return adj + (a - b)


if __name__ == "__main__":
    N, nfeat, nhid, nclass, nheads = 256, 64, 16, 8, 4
    alpha = 0.2
    dropout = 0.6  # unused in eval mode

    key = jax.random.PRNGKey(0)
    kx, kadj, kparams = jax.random.split(key, 3)

    x = jax.random.normal(kx, (N, nfeat), dtype=jnp.float32)

    # random sparse-ish directed adjacency with self loops, then symmetrized
    adj_raw = (jax.random.uniform(kadj, (N, N)) > 0.9).astype(jnp.float32)
    adj_raw = adj_raw + jnp.eye(N, dtype=jnp.float32)
    adj = symmetrize_adj(adj_raw)

    # int8 mask precomputed ONCE per graph (not per forward call).
    adj_mask = (adj > 0).astype(jnp.int8)

    params = init_gat_params(kparams, nfeat, nhid, nclass, nheads)

    out = gat_forward(x, adj_mask, params, alpha=alpha)
    out = jax.block_until_ready(out)

    assert out.shape == (N, nclass)
    assert bool(jnp.all(jnp.isfinite(out)))
    probs = jnp.exp(out)
    # rows of log_softmax must sum (in prob space) to 1
    assert bool(jnp.allclose(jnp.sum(probs, axis=1), 1.0, atol=1e-3))

    # tolerance checks vs f32 reference (bf16 MXU inputs + approx reciprocal)
    ref = gat_reference(x, adj, params, alpha=alpha)
    max_err = float(jnp.max(jnp.abs(out - ref)))
    assert max_err < 0.2, f"max |kernel - ref| (log space) = {max_err}"
    prob_err = float(jnp.max(jnp.abs(probs - jnp.exp(ref))))
    assert prob_err < 0.05, f"max |kernel - ref| (prob space) = {prob_err}"
    print("KERNEL_OK")
</pallas_src>

<mosaic_0001>
module attributes {stable_mosaic.version = 11 : i64} {
  func.func @_project_kernel(%arg0: i32, %arg1: memref<256x64xf32, #tpu.memory_space<vmem>>, %arg2: memref<64x128xf32, #tpu.memory_space<vmem>>, %arg3: memref<128x8xf32, #tpu.memory_space<vmem>>, %arg4: memref<256x128xbf16, #tpu.memory_space<vmem>>, %arg5: memref<256x4xf32, #tpu.memory_space<vmem>>, %arg6: memref<4x256xf32, #tpu.memory_space<vmem>>) attributes {dimension_semantics = [#tpu.dimension_semantics<arbitrary>], iteration_bounds = array<i64: 1>, scalar_prefetch = 0 : i64, scratch_operands = 0 : i64, tpu.core_type = #tpu.core_type<tc>, window_params = [{pipeline_mode = #tpu.pipeline_mode<synchronous>, transform_indices = @transform_0, window_bounds = array<i64: 256, 64>}, {pipeline_mode = #tpu.pipeline_mode<synchronous>, transform_indices = @transform_1, window_bounds = array<i64: 64, 128>}, {pipeline_mode = #tpu.pipeline_mode<synchronous>, transform_indices = @transform_2, window_bounds = array<i64: 128, 8>}, {pipeline_mode = #tpu.pipeline_mode<synchronous>, transform_indices = @transform_3, window_bounds = array<i64: 256, 128>}, {pipeline_mode = #tpu.pipeline_mode<synchronous>, transform_indices = @transform_4, window_bounds = array<i64: 256, 4>}, {pipeline_mode = #tpu.pipeline_mode<synchronous>, transform_indices = @transform_5, window_bounds = array<i64: 4, 256>}]} {
    %c0 = arith.constant 0 : index
    %c0_0 = arith.constant 0 : index
    %0 = vector.load %arg1[%c0, %c0_0] : memref<256x64xf32, #tpu.memory_space<vmem>>, vector<256x64xf32>
    %1 = arith.truncf %0 : vector<256x64xf32> to vector<256x64xbf16>
    %c0_1 = arith.constant 0 : index
    %c0_2 = arith.constant 0 : index
    %2 = vector.load %arg2[%c0_1, %c0_2] : memref<64x128xf32, #tpu.memory_space<vmem>>, vector<64x128xf32>
    %3 = arith.truncf %2 : vector<64x128xf32> to vector<64x128xbf16>
    %cst = arith.constant dense<0.000000e+00> : vector<256x128xf32>
    %4 = tpu.matmul %1, %3, %cst {dimension_numbers = #tpu.dot_dimension_numbers<[1], [0], [0], [1], [0, 0, 1, 1], [], []>} : vector<256x64xbf16>, vector<64x128xbf16>, vector<256x128xf32> -> vector<256x128xf32>
    %c0_3 = arith.constant 0 : index
    %c0_4 = arith.constant 0 : index
    %5 = vector.load %arg3[%c0_3, %c0_4] : memref<128x8xf32, #tpu.memory_space<vmem>>, vector<128x8xf32>
    %cst_5 = arith.constant dense<0.000000e+00> : vector<256x8xf32>
    %6 = tpu.matmul %4, %5, %cst_5 {dimension_numbers = #tpu.dot_dimension_numbers<[1], [0], [0], [1], [0, 0, 1, 1], [], []>} : vector<256x128xf32>, vector<128x8xf32>, vector<256x8xf32> -> vector<256x8xf32>
    %7 = arith.truncf %4 : vector<256x128xf32> to vector<256x128xbf16>
    %c0_6 = arith.constant 0 : index
    %c0_7 = arith.constant 0 : index
    %8 = vector.load %arg4[%c0_6, %c0_7] : memref<256x128xbf16, #tpu.memory_space<vmem>>, vector<256x128xbf16>
    tpu.vector_store %arg4[%c0_6, %c0_7], %7 {strides = array<i32>} : memref<256x128xbf16, #tpu.memory_space<vmem>>, vector<256x128xbf16>,
    %9 = vector.extract_strided_slice %6 {offsets = [0, 0], sizes = [256, 4], strides = [1, 1]} : vector<256x8xf32> to vector<256x4xf32>
    %c0_8 = arith.constant 0 : index
    %c0_9 = arith.constant 0 : index
    %10 = vector.load %arg5[%c0_8, %c0_9] : memref<256x4xf32, #tpu.memory_space<vmem>>, vector<256x4xf32>
    tpu.vector_store %arg5[%c0_8, %c0_9], %9 {strides = array<i32>} : memref<256x4xf32, #tpu.memory_space<vmem>>, vector<256x4xf32>,
    %11 = vector.extract_strided_slice %6 {offsets = [0, 4], sizes = [256, 4], strides = [1, 1]} : vector<256x8xf32> to vector<256x4xf32>
    %12 = tpu.transpose %11, [1, 0] : vector<256x4xf32> -> vector<4x256xf32>
    %c0_10 = arith.constant 0 : index
    %c0_11 = arith.constant 0 : index
    %13 = vector.load %arg6[%c0_10, %c0_11] : memref<4x256xf32, #tpu.memory_space<vmem>>, vector<4x256xf32>
    tpu.vector_store %arg6[%c0_10, %c0_11], %12 {strides = array<i32>} : memref<4x256xf32, #tpu.memory_space<vmem>>, vector<4x256xf32>,
    return
  }
  func.func @transform_0(%arg0: i32) -> (i32, i32) {
    %c0_i32 = arith.constant 0 : i32
    %c0_i32_0 = arith.constant 0 : i32
    %c0_i32_1 = arith.constant 0 : i32
    return %c0_i32, %c0_i32_0 : i32, i32
  }
  func.func @transform_1(%arg0: i32) -> (i32, i32) {
    %c0_i32 = arith.constant 0 : i32
    %c0_i32_0 = arith.constant 0 : i32
    %c0_i32_1 = arith.constant 0 : i32
    return %c0_i32, %c0_i32_0 : i32, i32
  }
  func.func @transform_2(%arg0: i32) -> (i32, i32) {
    %c0_i32 = arith.constant 0 : i32
    %c0_i32_0 = arith.constant 0 : i32
    %c0_i32_1 = arith.constant 0 : i32
    return %c0_i32, %c0_i32_0 : i32, i32
  }
  func.func @transform_3(%arg0: i32) -> (i32, i32) {
    %c0_i32 = arith.constant 0 : i32
    %c0_i32_0 = arith.constant 0 : i32
    %c0_i32_1 = arith.constant 0 : i32
    return %c0_i32, %c0_i32_0 : i32, i32
  }
  func.func @transform_4(%arg0: i32) -> (i32, i32) {
    %c0_i32 = arith.constant 0 : i32
    %c0_i32_0 = arith.constant 0 : i32
    %c0_i32_1 = arith.constant 0 : i32
    return %c0_i32, %c0_i32_0 : i32, i32
  }
  func.func @transform_5(%arg0: i32) -> (i32, i32) {
    %c0_i32 = arith.constant 0 : i32
    %c0_i32_0 = arith.constant 0 : i32
    %c0_i32_1 = arith.constant 0 : i32
    return %c0_i32, %c0_i32_0 : i32, i32
  }
}

</mosaic_0001>

<bundles_post_ra>
// kernel: tpu_custom_call.1
= control target key start
LH: loop header
LB: loop body
LE: loop exit
PB: predicated region body
PF: predicated region fallthrough
CT: control target
= control target key end

     0   :  { %11 = vsyncpa [#allocation3], 0  ;;  %s1270_s0 = inlined_call_operand.vmem [shape: f32[256,64], index: 0, kind: input, shape index: {}]   ;;  %s1271_s1 = inlined_call_operand.vmem [shape: f32[64,128], index: 1, kind: input, shape index: {}]   ;;  %s1272_s2 = inlined_call_operand.vmem [shape: f32[128,8], index: 2, kind: input, shape index: {}]   ;;  %s1273_s3 = inlined_call_operand.hbm [shape: bf16[256,128], index: 3, kind: output, shape index: {0}]   ;;  %s1274_s4 = inlined_call_operand.vmem [shape: f32[256,4], index: 4, kind: output, shape index: {1}]   ;;  %s1275_s5 = inlined_call_operand.hbm [shape: f32[4,256], index: 5, kind: output, shape index: {2}]  }
   0x1   :  { %v74_v0 = vld [vmem:[%s1271_s1 + $0x30] sm:$0xff]  ;;  %v75_v1 = vld [vmem:[%s1271_s1 + $0x38] sm:$0xff]  ;;  %v72_v2 = vld [vmem:[%s1271_s1 + $0x20] sm:$0xff] }
   0x2   :  { %v79_v3 = vpack.c.bf16 %v75_v1, %v74_v0  ;;  %v73_v4 = vld [vmem:[%s1271_s1 + $0x28] sm:$0xff]  ;;  %v70_v6 = vld [vmem:[%s1271_s1 + $0x10] sm:$0xff]  ;;  %v71_v7 = vld [vmem:[%s1271_s1 + $0x18] sm:$0xff] }
   0x3   :  { %v78_v5 = vpack.c.bf16 %v73_v4, %v72_v2 }
   0x4   :  { %133 = vmatpush.bf16.msra.mxu0 %v79_v3  ;;  %792 = vmatpush.bf16.msra.mxu3 %v79_v3 }
   0x5   :  { %12 = vsyncpa [#allocation5], 0  ;;  %v77_v8 = vpack.c.bf16 %v71_v7, %v70_v6  ;;  %v68_v9 = vld [vmem:[%s1271_s1] sm:$0xff]  ;;  %v69_v10 = vld [vmem:[%s1271_s1 + $0x8] sm:$0xff]  ;;  %vm80_vm0 = vcmask 523264   ;;  %vm411_vm1 = vcmask 31744  }
   0x6   :  { %v76_v11 = vpack.c.bf16 %v69_v10, %v68_v9  ;;  %v20_v12 = vld [vmem:[%s1270_s0] sm:$0xff]  ;;  %v21_v13 = vld [vmem:[%s1270_s0 + $0x8] sm:$0xff]  ;;  %v22_v15 = vld [vmem:[%s1270_s0 + $0x10] sm:$0xff]  ;;  %s885_s25 = smov 124   ;;  %s649_s11 = sshll.u32 %s1273_s3, 4  ;;  %vm639_vm2 = vcmask 1043456   ;;  %s650_s11 = int_to_ptr.hbm [resolvable:$true] %s649_s11 }
   0x7   :  { %v52_v14 = vpack.c.bf16 %v21_v13, %v20_v12  ;;  %v23_v16 = vld [vmem:[%s1270_s0 + $0x18] sm:$0xff]  ;;  %v24_v18 = vld [vmem:[%s1270_s0 + $0x20] sm:$0xff]  ;;  %v25_v19 = vld [vmem:[%s1270_s0 + $0x28] sm:$0xff]  ;;  %s887_s12 = smov 64   ;;  %s888_s13 = smov 4  }
   0x8   :  { %134 = vmatpush.bf16.msra.mxu0 %v78_v5  ;;  %793 = vmatpush.bf16.msra.mxu3 %v78_v5  ;;  %v53_v17 = vpack.c.bf16 %v23_v16, %v22_v15  ;;  %v54_v20 = vpack.c.bf16 %v25_v19, %v24_v18  ;;  %v26_v21 = vld [vmem:[%s1270_s0 + $0x30] sm:$0xff]  ;;  %v27_v22 = vld [vmem:[%s1270_s0 + $0x38] sm:$0xff]  ;;  %v28_v25 = vld [vmem:[%s1270_s0 + $0x40] sm:$0xff]  ;;  %s889_s3 = smov [#allocation4]   ;;  %s665_s16 = sshll.u32 %s1275_s5, 4  ;;  %s666_s16 = int_to_ptr.hbm [resolvable:$true] %s665_s16 }
   0x9   :  { %v55_v23 = vpack.c.bf16 %v27_v22, %v26_v21  ;;  %v233_v24 = vld [vmem:[%s1272_s2 + $0x78] sm:$0xff]  ;;  %v29_v26 = vld [vmem:[%s1270_s0 + $0x48] sm:$0xff]  ;;  %v232_v28 = vld [vmem:[%s1272_s2 + $0x70] sm:$0xff]  ;;  %s663_s14 = sshll.u32 %s889_s3, 4  ;;  %s664_s14 = int_to_ptr.vmem [resolvable:$true] %s663_s14 }
   0xa   :  { %234 = vmatpush.msra.mxu1 %v233_v24  ;;  %796 = vmatpush.msra.mxu2 %v233_v24  ;;  %v56_v27 = vpack.c.bf16 %v29_v26, %v28_v25  ;;  %v231_v29 = vld [vmem:[%s1272_s2 + $0x68] sm:$0xff]  ;;  %v230_v30 = vld [vmem:[%s1272_s2 + $0x60] sm:$0xff]  ;;  %v229_v31 = vld [vmem:[%s1272_s2 + $0x58] sm:$0xff] }
   0xb   :  { %v228_v32 = vld [vmem:[%s1272_s2 + $0x50] sm:$0xff]  ;;  %v227_v33 = vld [vmem:[%s1272_s2 + $0x48] sm:$0xff]  ;;  %v31_v35 = vld [vmem:[%s1270_s0 + $0x58] sm:$0xff] }
   0xc   :  { %135 = vmatpush.bf16.msra.mxu0 %v77_v8  ;;  %794 = vmatpush.bf16.msra.mxu3 %v77_v8  ;;  %v30_v34 = vld [vmem:[%s1270_s0 + $0x50] sm:$0xff]  ;;  %v226_v36 = vld [vmem:[%s1272_s2 + $0x40] sm:$0xff]  ;;  %v225_v38 = vld [vmem:[%s1272_s2 + $0x38] sm:$0xff] }
   0xd   :  { %235 = vmatpush.msra.mxu1 %v232_v28  ;;  %798 = vmatpush.msra.mxu2 %v232_v28  ;;  %v57_v37 = vpack.c.bf16 %v31_v35, %v30_v34  ;;  %v38_v39 = vld [vmem:[%s1270_s0 + $0x90] sm:$0xff]  ;;  %v39_v40 = vld [vmem:[%s1270_s0 + $0x98] sm:$0xff]  ;;  %v223_v43 = vld [vmem:[%s1272_s2 + $0x28] sm:$0xff] }
   0xe   :  { %v224_v41 = vld [vmem:[%s1272_s2 + $0x30] sm:$0xff]  ;;  %v61_v42 = vpack.c.bf16 %v39_v40, %v38_v39  ;;  %v222_v44 = vld [vmem:[%s1272_s2 + $0x20] sm:$0xff]  ;;  %v221_v45 = vld [vmem:[%s1272_s2 + $0x18] sm:$0xff] }
   0xf   :  { %236 = vmatpush.msra.mxu1 %v231_v29  ;;  %800 = vmatpush.msra.mxu2 %v231_v29  ;;  %v220_v46 = vld [vmem:[%s1272_s2 + $0x10] sm:$0xff]  ;;  %v219_v47 = vld [vmem:[%s1272_s2 + $0x8] sm:$0xff]  ;;  %v32_v48 = vld [vmem:[%s1270_s0 + $0x60] sm:$0xff] }
  0x10   :  { %136 = vmatpush.bf16.msra.mxu0 %v76_v11  ;;  %795 = vmatpush.bf16.msra.mxu3 %v76_v11  ;;  %v33_v49 = vld [vmem:[%s1270_s0 + $0x68] sm:$0xff]  ;;  %v218_v51 = vld [vmem:[%s1272_s2] sm:$0xff]  ;;  %v34_v55 = vld [vmem:[%s1270_s0 + $0x70] sm:$0xff] }
  0x11   :  { %237 = vmatpush.msra.mxu1 %v230_v30  ;;  %802 = vmatpush.msra.mxu2 %v230_v30  ;;  %v58_v50 = vpack.c.bf16 %v33_v49, %v32_v48  ;;  %v40_v52 = vld [vmem:[%s1270_s0 + $0xa0] sm:$0xff]  ;;  %v41_v53 = vld [vmem:[%s1270_s0 + $0xa8] sm:$0xff]  ;;  %v35_v56 = vld [vmem:[%s1270_s0 + $0x78] sm:$0xff] }
  0x12   :  { %v62_v54 = vpack.c.bf16 %v41_v53, %v40_v52  ;;  %v59_v57 = vpack.c.bf16 %v35_v56, %v34_v55  ;;  %v42_v58 = vld [vmem:[%s1270_s0 + $0xb0] sm:$0xff]  ;;  %v43_v59 = vld [vmem:[%s1270_s0 + $0xb8] sm:$0xff]  ;;  %v36_v61 = vld [vmem:[%s1270_s0 + $0x80] sm:$0xff] }
  0x13   :  { %681 = vmatmul.msk.bf16.vlgmr.msra.gmra.mxu0 %vm80_vm0, %v52_v14  ;;  %238 = vmatpush.msra.mxu1 %v229_v31  ;;  %v63_v60 = vpack.c.bf16 %v43_v59, %v42_v58  ;;  %v37_v62 = vld [vmem:[%s1270_s0 + $0x88] sm:$0xff]  ;;  %v44_v1 = vld [vmem:[%s1270_s0 + $0xc0] sm:$0xff]  ;;  %v46_v7 = vld [vmem:[%s1270_s0 + $0xd0] sm:$0xff] }
  0x14   :  { %797 = vmatpush.msrb.mxu3 %v233_v24  ;;  %804 = vmatpush.msra.mxu2 %v229_v31  ;;  %v60_v63 = vpack.c.bf16 %v37_v62, %v36_v61  ;;  %v45_v2 = vld [vmem:[%s1270_s0 + $0xc8] sm:$0xff]  ;;  %v47_v8 = vld [vmem:[%s1270_s0 + $0xd8] sm:$0xff]  ;;  %v48_v13 = vld [vmem:[%s1270_s0 + $0xe0] sm:$0xff] }
  0x15   :  { %239 = vmatpush.msra.mxu1 %v228_v32  ;;  %690 = vmatmul.msk.bf16.vlgmr.msra.gmra.mxu3 %vm80_vm0, %v61_v42  ;;  %v64_v3 = vpack.c.bf16 %v45_v2, %v44_v1  ;;  %v65_v9 = vpack.c.bf16 %v47_v8, %v46_v7  ;;  %v49_v14 = vld [vmem:[%s1270_s0 + $0xe8] sm:$0xff]  ;;  %v50_v19 = vld [vmem:[%s1270_s0 + $0xf0] sm:$0xff] }
  0x16   :  { %799 = vmatpush.msrb.mxu3 %v232_v28  ;;  %806 = vmatpush.msra.mxu2 %v228_v32  ;;  %v66_v15 = vpack.c.bf16 %v49_v14, %v48_v13 }
  0x17   :  { %240 = vmatpush.msra.mxu1 %v227_v33 }
  0x18   :  { %801 = vmatpush.msrb.mxu3 %v231_v29  ;;  %808 = vmatpush.msra.mxu2 %v227_v33 }
  0x19   :  { %241 = vmatpush.msra.mxu1 %v226_v36 }
  0x1a   :  { %803 = vmatpush.msrb.mxu3 %v230_v30  ;;  %810 = vmatpush.msra.mxu2 %v226_v36 }
  0x1b   :  { %242 = vmatpush.msra.mxu1 %v225_v38 }
  0x1c   :  { %805 = vmatpush.msrb.mxu3 %v229_v31  ;;  %812 = vmatpush.msra.mxu2 %v225_v38 }
  0x1d   :  { %243 = vmatpush.msra.mxu1 %v224_v41 }
  0x1e   :  { %807 = vmatpush.msrb.mxu3 %v228_v32  ;;  %814 = vmatpush.msra.mxu2 %v224_v41 }
  0x1f   :  { %244 = vmatpush.msra.mxu1 %v223_v43 }
  0x20   :  { %809 = vmatpush.msrb.mxu3 %v227_v33  ;;  %816 = vmatpush.msra.mxu2 %v223_v43 }
  0x21   :  { %245 = vmatpush.msra.mxu1 %v222_v44 }
  0x22   :  { %811 = vmatpush.msrb.mxu3 %v226_v36  ;;  %818 = vmatpush.msra.mxu2 %v222_v44 }
  0x23   :  { %682 = vmatmul.msk.bf16.gmra.mxu0 %vm80_vm0, %v53_v17  ;;  %246 = vmatpush.msra.mxu1 %v221_v45 }
  0x24   :  { %813 = vmatpush.msrb.mxu3 %v225_v38  ;;  %820 = vmatpush.msra.mxu2 %v221_v45 }
  0x25   :  { %247 = vmatpush.msra.mxu1 %v220_v46  ;;  %691 = vmatmul.msk.bf16.gmra.mxu3 %vm80_vm0, %v62_v54 }
  0x26   :  { %815 = vmatpush.msrb.mxu3 %v224_v41  ;;  %822 = vmatpush.msra.mxu2 %v220_v46 }
  0x27   :  { %248 = vmatpush.msra.mxu1 %v219_v47 }
  0x28   :  { %817 = vmatpush.msrb.mxu3 %v223_v43  ;;  %824 = vmatpush.msra.mxu2 %v219_v47 }
  0x29   :  { %249 = vmatpush.msra.mxu1 %v218_v51 }
  0x2a   :  { %819 = vmatpush.msrb.mxu3 %v222_v44  ;;  %826 = vmatpush.msra.mxu2 %v218_v51 }
  0x2c   :  { %821 = vmatpush.msrb.mxu3 %v221_v45 }
  0x2e   :  { %823 = vmatpush.msrb.mxu3 %v220_v46 }
  0x30   :  { %825 = vmatpush.msrb.mxu3 %v219_v47 }
  0x32   :  { %827 = vmatpush.msrb.mxu3 %v218_v51 }
  0x33   :  { %683 = vmatmul.msk.bf16.gmra.mxu0 %vm80_vm0, %v54_v20  ;;  %v51_v20 = vld [vmem:[%s1270_s0 + $0xf8] sm:$0xff] }
  0x34   :  { %v67_v21 = vpack.c.bf16 %v51_v20, %v50_v19 }
  0x35   :  { %692 = vmatmul.msk.bf16.gmra.mxu3 %vm80_vm0, %v63_v60 }
  0x43   :  { %684 = vmatmul.msk.bf16.gmra.mxu0 %vm80_vm0, %v55_v23 }
  0x45   :  { %693 = vmatmul.msk.bf16.gmra.mxu3 %vm80_vm0, %v64_v3 }
  0x53   :  { %685 = vmatmul.msk.bf16.gmra.mxu0 %vm80_vm0, %v56_v27 }
  0x55   :  { %694 = vmatmul.msk.bf16.gmra.mxu3 %vm80_vm0, %v65_v9 }
  0x63   :  { %686 = vmatmul.msk.bf16.gmra.mxu0 %vm80_vm0, %v57_v37 }
  0x65   :  { %695 = vmatmul.msk.bf16.gmra.mxu3 %vm80_vm0, %v66_v15 }
  0x73   :  { %687 = vmatmul.msk.bf16.gmra.mxu0 %vm80_vm0, %v58_v50 }
  0x75   :  { %696 = vmatmul.msk.bf16.gmra.mxu3 %vm80_vm0, %v67_v21 }
  0x83   :  { %688 = vmatmul.msk.bf16.gmra.mxu0 %vm80_vm0, %v59_v57 }
  0x90   :  { %v138_v0 = vpop.f32.mrf.mxu0 }
  0x91   :  { %250 = vmatmul.f32.vlgmr.msra.gmra.mxu1 %v138_v0 }
  0x93   :  { %689 = vmatmul.msk.bf16.gmra.mxu0 %vm80_vm0, %v60_v63 }
  0x98   :  { %v140_v4 = vpop.f32.mrf.mxu0  ;;  %v183_v29 = vpop.f32.mrf.mxu3 }
  0x99   :  { %v700_v5 = vpack.c.bf16 %v140_v4, %v138_v0  ;;  %253 = vmatmul.f32.gmra.mxu1 %v140_v4 }
  0x9b   :  { %701 = vst [vmem:[#allocation2] sm:$0xff] %v700_v5  }
  0xa0   :  { %v143_v6 = vpop.f32.mrf.mxu0  ;;  %v185_v32 = vpop.f32.mrf.mxu3 }
  0xa1   :  { %256 = vmatmul.f32.gmra.mxu1 %v143_v6  ;;  %v745_v33 = vpack.c.bf16 %v185_v32, %v183_v29 }
  0xa3   :  { %785 = vst [vmem:[#allocation2 + $0x48] sm:$0xff] %v745_v33  }
  0xa8   :  { %v145_v10 = vpop.f32.mrf.mxu0  ;;  %v188_v35 = vpop.f32.mrf.mxu3 }
  0xa9   :  { %v705_v11 = vpack.c.bf16 %v145_v10, %v143_v6  ;;  %259 = vmatmul.f32.gmra.mxu1 %v145_v10 }
  0xab   :  { %777 = vst [vmem:[#allocation2 + $0x8] sm:$0xff] %v705_v11  }
  0xb0   :  { %v148_v12 = vpop.f32.mrf.mxu0  ;;  %v190_v38 = vpop.f32.mrf.mxu3 }
  0xb1   :  { %262 = vmatmul.f32.gmra.mxu1 %v148_v12  ;;  %v750_v39 = vpack.c.bf16 %v190_v38, %v188_v35 }
  0xb3   :  { %786 = vst [vmem:[#allocation2 + $0x50] sm:$0xff] %v750_v39  }
  0xb8   :  { %v150_v16 = vpop.f32.mrf.mxu0  ;;  %v193_v41 = vpop.f32.mrf.mxu3 }
  0xb9   :  { %v710_v17 = vpack.c.bf16 %v150_v16, %v148_v12  ;;  %265 = vmatmul.f32.gmra.mxu1 %v150_v16 }
  0xbb   :  { %778 = vst [vmem:[#allocation2 + $0x10] sm:$0xff] %v710_v17  }
  0xc0   :  { %v153_v18 = vpop.f32.mrf.mxu0  ;;  %v195_v45 = vpop.f32.mrf.mxu3 }
  0xc1   :  { %268 = vmatmul.f32.gmra.mxu1 %v153_v18  ;;  %v755_v46 = vpack.c.bf16 %v195_v45, %v193_v41 }
  0xc3   :  { %787 = vst [vmem:[#allocation2 + $0x58] sm:$0xff] %v755_v46  }
  0xc8   :  { %v155_v22 = vpop.f32.mrf.mxu0  ;;  %v198_v49 = vpop.f32.mrf.mxu3 }
  0xc9   :  { %v715_v23 = vpack.c.bf16 %v155_v22, %v153_v18  ;;  %271 = vmatmul.f32.gmra.mxu1 %v155_v22 }
  0xcb   :  { %779 = vst [vmem:[#allocation2 + $0x18] sm:$0xff] %v715_v23  }
  0xd0   :  { %v158_v24 = vpop.f32.mrf.mxu0  ;;  %v200_v52 = vpop.f32.mrf.mxu3 }
  0xd1   :  { %274 = vmatmul.f32.gmra.mxu1 %v158_v24  ;;  %v760_v53 = vpack.c.bf16 %v200_v52, %v198_v49 }
  0xd3   :  { %788 = vst [vmem:[#allocation2 + $0x60] sm:$0xff] %v760_v53  }
  0xd8   :  { %v160_v25 = vpop.f32.mrf.mxu0  ;;  %v203_v55 = vpop.f32.mrf.mxu3 }
  0xd9   :  { %v720_v26 = vpack.c.bf16 %v160_v25, %v158_v24  ;;  %277 = vmatmul.f32.gmra.mxu1 %v160_v25 }
  0xdb   :  { %780 = vst [vmem:[#allocation2 + $0x20] sm:$0xff] %v720_v26  }
  0xe0   :  { %v163_v27 = vpop.f32.mrf.mxu0  ;;  %v205_v57 = vpop.f32.mrf.mxu3 }
  0xe1   :  { %280 = vmatmul.f32.gmra.mxu1 %v163_v27  ;;  %v765_v58 = vpack.c.bf16 %v205_v57, %v203_v55 }
  0xe3   :  { %789 = vst [vmem:[#allocation2 + $0x68] sm:$0xff] %v765_v58  }
  0xe8   :  { %v165_v28 = vpop.f32.mrf.mxu0  ;;  %v208_v60 = vpop.f32.mrf.mxu3 }
  0xe9   :  { %v725_v30 = vpack.c.bf16 %v165_v28, %v163_v27  ;;  %283 = vmatmul.f32.gmra.mxu1 %v165_v28 }
  0xeb   :  { %781 = vst [vmem:[#allocation2 + $0x28] sm:$0xff] %v725_v30  }
  0xf0   :  { %v168_v31 = vpop.f32.mrf.mxu0  ;;  %v210_v62 = vpop.f32.mrf.mxu3 }
  0xf1   :  { %286 = vmatmul.f32.gmra.mxu1 %v168_v31  ;;  %v770_v63 = vpack.c.bf16 %v210_v62, %v208_v60 }
  0xf3   :  { %790 = vst [vmem:[#allocation2 + $0x70] sm:$0xff] %v770_v63  }
  0xf8   :  { %v170_v34 = vpop.f32.mrf.mxu0  ;;  %v213_v1 = vpop.f32.mrf.mxu3 }
  0xf9   :  { %v730_v36 = vpack.c.bf16 %v170_v34, %v168_v31  ;;  %289 = vmatmul.f32.gmra.mxu1 %v170_v34  ;;  %340 = vmatmul.f32.vlgmr.msrb.gmra.mxu3 %v213_v1 }
  0xfb   :  { %782 = vst [vmem:[#allocation2 + $0x30] sm:$0xff] %v730_v36  }
 0x100   :  { %v173_v37 = vpop.f32.mrf.mxu0  ;;  %v215_v3 = vpop.f32.mrf.mxu3 }
 0x101   :  { %292 = vmatmul.f32.gmra.mxu1 %v173_v37  ;;  %v775_v4 = vpack.c.bf16 %v215_v3, %v213_v1  ;;  %343 = vmatmul.f32.gmra.mxu3 %v215_v3 }
 0x103   :  { %791 = vst [vmem:[#allocation2 + $0x78] sm:$0xff] %v775_v4  }
 0x108   :  { %v175_v40 = vpop.f32.mrf.mxu0 }
 0x109   :  { %v735_v42 = vpack.c.bf16 %v175_v40, %v173_v37  ;;  %295 = vmatmul.f32.vlgmr.msra.gmra.mxu2 %v175_v40 }
 0x10b   :  { %783 = vst [vmem:[#allocation2 + $0x38] sm:$0xff] %v735_v42  }
 0x10e   :  { %v251_v43 = vpop.f32.mrf.mxu1 }
 0x10f   :  { %412 = vst.msk [vmem:[%s1274_s4] sm:$0xff] %vm411_vm1, %v251_v43  ;;  %476 = vrot.lane.b32.xlu0 %v251_v43, %s885_s25 }
 0x110   :  { %v178_v44 = vpop.f32.mrf.mxu0 }
 0x111   :  { %298 = vmatmul.f32.gmra.mxu2 %v178_v44 }
 0x116   :  { %v254_v47 = vpop.f32.mrf.mxu1 }
 0x117   :  { %413 = vst.msk [vmem:[%s1274_s4 + $0x8] sm:$0xff] %vm411_vm1, %v254_v47  ;;  %478 = vrot.lane.b32.xlu0 %v254_v47, %s885_s25 }
 0x118   :  { %v180_v48 = vpop.f32.mrf.mxu0 }
 0x119   :  { %v740_v50 = vpack.c.bf16 %v180_v48, %v178_v44  ;;  %301 = vmatmul.f32.gmra.mxu2 %v180_v48 }
 0x11b   :  { %784 = vst [vmem:[#allocation2 + $0x40] sm:$0xff] %v740_v50  }
 0x11e   :  { %v257_v51 = vpop.f32.mrf.mxu1 }
 0x11f   :  { %414 = vst.msk [vmem:[%s1274_s4 + $0x10] sm:$0xff] %vm411_vm1, %v257_v51  ;;  %480 = vrot.lane.b32.xlu1 %v257_v51, %s885_s25 }
 0x121   :  { %304 = vmatmul.f32.gmra.mxu2 %v183_v29 }
 0x126   :  { %v260_v54 = vpop.f32.mrf.mxu1 }
 0x127   :  { %415 = vst.msk [vmem:[%s1274_s4 + $0x18] sm:$0xff] %vm411_vm1, %v260_v54  ;;  %482 = vrot.lane.b32.xlu1 %v260_v54, %s885_s25 }
 0x129   :  { %307 = vmatmul.f32.gmra.mxu2 %v185_v32 }
 0x12e   :  { %v263_v56 = vpop.f32.mrf.mxu1 }
 0x12f   :  { %416 = vst.msk [vmem:[%s1274_s4 + $0x20] sm:$0xff] %vm411_vm1, %v263_v56  ;;  %484 = vrot.lane.b32.xlu2 %v263_v56, %s885_s25 }
 0x131   :  { %310 = vmatmul.f32.gmra.mxu2 %v188_v35 }
 0x136   :  { %v266_v59 = vpop.f32.mrf.mxu1 }
 0x137   :  { %417 = vst.msk [vmem:[%s1274_s4 + $0x28] sm:$0xff] %vm411_vm1, %v266_v59  ;;  %486 = vrot.lane.b32.xlu2 %v266_v59, %s885_s25 }
 0x139   :  { %313 = vmatmul.f32.gmra.mxu2 %v190_v38 }
 0x13e   :  { %v269_v61 = vpop.f32.mrf.mxu1 }
 0x13f   :  { %418 = vst.msk [vmem:[%s1274_s4 + $0x30] sm:$0xff] %vm411_vm1, %v269_v61  ;;  %488 = vrot.lane.b32.xlu0 %v269_v61, %s885_s25 }
 0x141   :  { %316 = vmatmul.f32.gmra.mxu2 %v193_v41 }
 0x146   :  { %v272_v0 = vpop.f32.mrf.mxu1 }
 0x147   :  { %419 = vst.msk [vmem:[%s1274_s4 + $0x38] sm:$0xff] %vm411_vm1, %v272_v0  ;;  %490 = vrot.lane.b32.xlu1 %v272_v0, %s885_s25 }
 0x149   :  { %319 = vmatmul.f32.gmra.mxu2 %v195_v45 }
 0x14e   :  { %v275_v2 = vpop.f32.mrf.mxu1 }
 0x14f   :  { %420 = vst.msk [vmem:[%s1274_s4 + $0x40] sm:$0xff] %vm411_vm1, %v275_v2  ;;  %492 = vrot.lane.b32.xlu2 %v275_v2, %s885_s25 }
 0x151   :  { %322 = vmatmul.f32.gmra.mxu2 %v198_v49 }
 0x156   :  { %v278_v5 = vpop.f32.mrf.mxu1 }
 0x157   :  { %421 = vst.msk [vmem:[%s1274_s4 + $0x48] sm:$0xff] %vm411_vm1, %v278_v5  ;;  %494 = vrot.lane.b32.xlu0 %v278_v5, %s885_s25 }
 0x159   :  { %325 = vmatmul.f32.gmra.mxu2 %v200_v52 }
 0x15e   :  { %v281_v6 = vpop.f32.mrf.mxu1 }
 0x15f   :  { %422 = vst.msk [vmem:[%s1274_s4 + $0x50] sm:$0xff] %vm411_vm1, %v281_v6  ;;  %496 = vrot.lane.b32.xlu1 %v281_v6, %s885_s25 }
 0x161   :  { %328 = vmatmul.f32.gmra.mxu2 %v203_v55 }
 0x166   :  { %v284_v7 = vpop.f32.mrf.mxu1 }
 0x167   :  { %423 = vst.msk [vmem:[%s1274_s4 + $0x58] sm:$0xff] %vm411_vm1, %v284_v7  ;;  %498 = vrot.lane.b32.xlu2 %v284_v7, %s885_s25 }
 0x169   :  { %331 = vmatmul.f32.gmra.mxu2 %v205_v57 }
 0x16e   :  { %v287_v8 = vpop.f32.mrf.mxu1 }
 0x16f   :  { %424 = vst.msk [vmem:[%s1274_s4 + $0x60] sm:$0xff] %vm411_vm1, %v287_v8  ;;  %500 = vrot.lane.b32.xlu0 %v287_v8, %s885_s25 }
 0x171   :  { %334 = vmatmul.f32.gmra.mxu2 %v208_v60 }
 0x176   :  { %v290_v9 = vpop.f32.mrf.mxu1 }
 0x177   :  { %425 = vst.msk [vmem:[%s1274_s4 + $0x68] sm:$0xff] %vm411_vm1, %v290_v9  ;;  %502 = vrot.lane.b32.xlu1 %v290_v9, %s885_s25 }
 0x179   :  { %337 = vmatmul.f32.gmra.mxu2 %v210_v62 }
 0x17c   :  { %v341_v20 = vpop.f32.mrf.mxu3 }
 0x17d   :  { %442 = vst.msk [vmem:[%s1274_s4 + $0xf0] sm:$0xff] %vm411_vm1, %v341_v20 }
 0x17e   :  { %v293_v10 = vpop.f32.mrf.mxu1 }
 0x17f   :  { %426 = vst.msk [vmem:[%s1274_s4 + $0x70] sm:$0xff] %vm411_vm1, %v293_v10  ;;  %504 = vrot.lane.b32.xlu2 %v293_v10, %s885_s25 }
 0x181   :  { %v477_v28 = vpop.permute.xlu0 %476 }
 0x184   :  { %v344_v22 = vpop.f32.mrf.mxu3 }
 0x185   :  { %443 = vst.msk [vmem:[%s1274_s4 + $0xf8] sm:$0xff] %vm411_vm1, %v344_v22 }
 0x189   :  { %v485_v27 = vpop.permute.xlu2 %484  ;;  %v479_v33 = vpop.permute.xlu0 %478 }
 0x18c   :  { %v296_v11 = vpop.f32.mrf.mxu2 }
 0x18d   :  { %427 = vst.msk [vmem:[%s1274_s4 + $0x78] sm:$0xff] %vm411_vm1, %v296_v11  ;;  %506 = vrot.lane.b32.xlu0 %v296_v11, %s885_s25 }
 0x191   :  { %v481_v25 = vpop.permute.xlu1 %480  ;;  %v487_v32 = vpop.permute.xlu2 %486 }
 0x194   :  { %v299_v12 = vpop.f32.mrf.mxu2 }
 0x195   :  { %428 = vst.msk [vmem:[%s1274_s4 + $0x80] sm:$0xff] %vm411_vm1, %v299_v12  ;;  %508 = vrot.lane.b32.xlu1 %v299_v12, %s885_s25 }
 0x199   :  { %v483_v30 = vpop.permute.xlu1 %482 }
 0x19c   :  { %v302_v13 = vpop.f32.mrf.mxu2 }
 0x19d   :  { %429 = vst.msk [vmem:[%s1274_s4 + $0x88] sm:$0xff] %vm411_vm1, %v302_v13  ;;  %510 = vrot.lane.b32.xlu2 %v302_v13, %s885_s25 }
 0x1a4   :  { %v305_v14 = vpop.f32.mrf.mxu2 }
 0x1a5   :  { %430 = vst.msk [vmem:[%s1274_s4 + $0x90] sm:$0xff] %vm411_vm1, %v305_v14  ;;  %512 = vrot.lane.b32.xlu0 %v305_v14, %s885_s25 }
 0x1a9   :  { %v493_v35 = vpop.permute.xlu2 %492 }
 0x1ac   :  { %v308_v15 = vpop.f32.mrf.mxu2 }
 0x1ad   :  { %431 = vst.msk [vmem:[%s1274_s4 + $0x98] sm:$0xff] %vm411_vm1, %v308_v15  ;;  %514 = vrot.lane.b32.xlu1 %v308_v15, %s885_s25 }
 0x1b1   :  { %v489_v36 = vpop.permute.xlu0 %488 }
 0x1b4   :  { %v311_v16 = vpop.f32.mrf.mxu2 }
 0x1b5   :  { %432 = vst.msk [vmem:[%s1274_s4 + $0xa0] sm:$0xff] %vm411_vm1, %v311_v16  ;;  %516 = vrot.lane.b32.xlu2 %v311_v16, %s885_s25 }
 0x1b9   :  { %v491_v34 = vpop.permute.xlu1 %490 }
 0x1bc   :  { %v314_v17 = vpop.f32.mrf.mxu2 }
 0x1bd   :  { %433 = vst.msk [vmem:[%s1274_s4 + $0xa8] sm:$0xff] %vm411_vm1, %v314_v17  ;;  %518 = vrot.lane.b32.xlu0 %v314_v17, %s885_s25 }
 0x1c1   :  { %v499_v38 = vpop.permute.xlu2 %498 }
 0x1c4   :  { %v317_v18 = vpop.f32.mrf.mxu2 }
 0x1c5   :  { %434 = vst.msk [vmem:[%s1274_s4 + $0xb0] sm:$0xff] %vm411_vm1, %v317_v18  ;;  %520 = vrot.lane.b32.xlu1 %v317_v18, %s885_s25 }
 0x1c9   :  { %v495_v39 = vpop.permute.xlu0 %494 }
 0x1cc   :  { %v320_v19 = vpop.f32.mrf.mxu2 }
 0x1cd   :  { %435 = vst.msk [vmem:[%s1274_s4 + $0xb8] sm:$0xff] %vm411_vm1, %v320_v19  ;;  %522 = vrot.lane.b32.xlu2 %v320_v19, %s885_s25 }
 0x1d1   :  { %v497_v37 = vpop.permute.xlu1 %496 }
 0x1d4   :  { %v323_v21 = vpop.f32.mrf.mxu2 }
 0x1d5   :  { %436 = vst.msk [vmem:[%s1274_s4 + $0xc0] sm:$0xff] %vm411_vm1, %v323_v21  ;;  %524 = vrot.lane.b32.xlu0 %v323_v21, %s885_s25 }
 0x1d9   :  { %v505_v41 = vpop.permute.xlu2 %504 }
 0x1dc   :  { %v326_v23 = vpop.f32.mrf.mxu2 }
 0x1dd   :  { %437 = vst.msk [vmem:[%s1274_s4 + $0xc8] sm:$0xff] %vm411_vm1, %v326_v23  ;;  %526 = vrot.lane.b32.xlu1 %v326_v23, %s885_s25 }
 0x1e1   :  { %v501_v42 = vpop.permute.xlu0 %500 }
 0x1e4   :  { %v329_v24 = vpop.f32.mrf.mxu2 }
 0x1e5   :  { %438 = vst.msk [vmem:[%s1274_s4 + $0xd0] sm:$0xff] %vm411_vm1, %v329_v24  ;;  %528 = vrot.lane.b32.xlu2 %v329_v24, %s885_s25 }
 0x1e9   :  { %v503_v40 = vpop.permute.xlu1 %502 }
 0x1ec   :  { %v332_v26 = vpop.f32.mrf.mxu2 }
 0x1ed   :  { %439 = vst.msk [vmem:[%s1274_s4 + $0xd8] sm:$0xff] %vm411_vm1, %v332_v26  ;;  %530 = vrot.lane.b32.xlu0 %v332_v26, %s885_s25 }
 0x1f4   :  { %v335_v29 = vpop.f32.mrf.mxu2 }
 0x1f5   :  { %440 = vst.msk [vmem:[%s1274_s4 + $0xe0] sm:$0xff] %vm411_vm1, %v335_v29  ;;  %536 = vrot.lane.b32.xlu0 %v341_v20, %s885_s25  ;;  %532 = vrot.lane.b32.xlu1 %v335_v29, %s885_s25 }
 0x1f7   :  { %v511_v44 = vpop.permute.xlu2 %510 }
 0x1fc   :  { %v338_v31 = vpop.f32.mrf.mxu2 }
 0x1fd   :  { %441 = vst.msk [vmem:[%s1274_s4 + $0xe8] sm:$0xff] %vm411_vm1, %v338_v31  ;;  %538 = vrot.lane.b32.xlu1 %v344_v22, %s885_s25  ;;  %534 = vrot.lane.b32.xlu2 %v338_v31, %s885_s25  ;;  %s886_s4 = smov [#allocation2]  }
 0x1fe   :  { %s647_s25 = sshll.u32 %s886_s4, 4  ;;  %s648_s25 = int_to_ptr.vmem [resolvable:$true] %s647_s25 }
 0x1ff   :  { %v507_v45 = vpop.permute.xlu0 %506  ;;  %655 = dma.vmem_to_hbm [thread:$0]  %s648_s25, 2048, %s650_s11, [#allocation3], %s887_s12, %s887_s12, %s888_s13  }
 0x207   :  { %v509_v43 = vpop.permute.xlu1 %508 }
 0x20f   :  { %v517_v48 = vpop.permute.xlu2 %516 }
 0x217   :  { %604 = vxpose.xlu0.b32.start [1/16] (narrow) %v509_v43, 8  ;;  %v513_v46 = vpop.permute.xlu0 %512 }
 0x21f   :  { %605 = vxpose.xlu0.b32.cont [2/16] (narrow) %v511_v44, 8  ;;  %v515_v47 = vpop.permute.xlu1 %514 }
 0x223   :  { %572 = vxpose.xlu2.b32.start [1/16] (narrow) %v477_v28, 8 }
 0x227   :  { %606 = vxpose.xlu0.b32.cont [3/16] (narrow) %v513_v46, 8  ;;  %v523_v51 = vpop.permute.xlu2 %522 }
 0x22b   :  { %573 = vxpose.xlu2.b32.cont [2/16] (narrow) %v479_v33, 8 }
 0x22f   :  { %607 = vxpose.xlu0.b32.cont [4/16] (narrow) %v515_v47, 8  ;;  %v519_v49 = vpop.permute.xlu0 %518 }
 0x233   :  { %574 = vxpose.xlu2.b32.cont [3/16] (narrow) %v481_v25, 8 }
 0x237   :  { %608 = vxpose.xlu0.b32.cont [5/16] (narrow) %v517_v48, 8  ;;  %v521_v50 = vpop.permute.xlu1 %520 }
 0x23b   :  { %575 = vxpose.xlu2.b32.cont [4/16] (narrow) %v483_v30, 8 }
 0x23f   :  { %609 = vxpose.xlu0.b32.cont [6/16] (narrow) %v519_v49, 8  ;;  %v529_v54 = vpop.permute.xlu2 %528 }
 0x243   :  { %576 = vxpose.xlu2.b32.cont [5/16] (narrow) %v485_v27, 8 }
 0x247   :  { %610 = vxpose.xlu0.b32.cont [7/16] (narrow) %v521_v50, 8  ;;  %v525_v52 = vpop.permute.xlu0 %524 }
 0x24b   :  { %577 = vxpose.xlu2.b32.cont [6/16] (narrow) %v487_v32, 8 }
 0x24f   :  { %611 = vxpose.xlu0.b32.cont [8/16] (narrow) %v523_v51, 8  ;;  %v527_v53 = vpop.permute.xlu1 %526 }
 0x253   :  { %578 = vxpose.xlu2.b32.cont [7/16] (narrow) %v489_v36, 8 }
 0x257   :  { %612 = vxpose.xlu0.b32.cont [9/16] (narrow) %v525_v52, 8  ;;  %v535_v57 = vpop.permute.xlu2 %534 }
 0x25b   :  { %579 = vxpose.xlu2.b32.cont [8/16] (narrow) %v491_v34, 8 }
 0x25f   :  { %613 = vxpose.xlu0.b32.cont [10/16] (narrow) %v527_v53, 8  ;;  %v531_v55 = vpop.permute.xlu0 %530 }
 0x263   :  { %580 = vxpose.xlu2.b32.cont [9/16] (narrow) %v493_v35, 8 }
 0x267   :  { %614 = vxpose.xlu0.b32.cont [11/16] (narrow) %v529_v54, 8  ;;  %v533_v56 = vpop.permute.xlu1 %532  ;;  %v537_v58 = vpop.permute.xlu0 %536 }
 0x26b   :  { %581 = vxpose.xlu2.b32.cont [10/16] (narrow) %v495_v39, 8 }
 0x26f   :  { %615 = vxpose.xlu0.b32.cont [12/16] (narrow) %v531_v55, 8  ;;  %v539_v59 = vpop.permute.xlu1 %538 }
 0x273   :  { %582 = vxpose.xlu2.b32.cont [11/16] (narrow) %v497_v37, 8 }
 0x277   :  { %616 = vxpose.xlu0.b32.cont [13/16] (narrow) %v533_v56, 8 }
 0x27b   :  { %583 = vxpose.xlu2.b32.cont [12/16] (narrow) %v499_v38, 8 }
 0x27f   :  { %617 = vxpose.xlu0.b32.cont [14/16] (narrow) %v535_v57, 8 }
 0x283   :  { %584 = vxpose.xlu2.b32.cont [13/16] (narrow) %v501_v42, 8 }
 0x287   :  { %618 = vxpose.xlu0.b32.cont [15/16] (narrow) %v537_v58, 8 }
 0x28b   :  { %585 = vxpose.xlu2.b32.cont [14/16] (narrow) %v503_v40, 8 }
 0x28f   :  { %619 = vxpose.xlu0.b32.end [16/16] (narrow) %v539_v59, 8 }
 0x293   :  { %586 = vxpose.xlu2.b32.cont [15/16] (narrow) %v505_v41, 8 }
 0x29b   :  { %587 = vxpose.xlu2.b32.end [16/16] (narrow) %v507_v45, 8 }
 0x2bb   :  { %v620_v60 = vpop.trf.xlu0 }
 0x2bc   :  { %v638_v61 = vrot.slane %v620_v60, 4  ;;  %v588_v62 = vpop.trf.xlu2 }
 0x2be   :  { %v640_v63 = vsel %vm639_vm2, %v588_v62, %v638_v61 }
 0x2bf   :  { %642 = vst [vmem:[#allocation4] sm:$0xff] %v640_v63 }
 0x2c0   :  { %668 = dma.vmem_to_hbm [thread:$0]  %s664_s14, 128, %s666_s16, [#allocation5]  }
 0x2c1   :  { %881 = dma.done.wait [#allocation3], 2048  }
 0x2c2   :  { %882 = vsyncadd [#allocation3], 4294965248 }
 0x2c3   :  { %883 = dma.done.wait [#allocation5], 128  }
 0x2c4   :  { %884 = vsyncadd [#allocation5], 4294967168 }
 0x2c5   :  { %679 = vsyncpa [#allocation3], 1 }
 0x2c6   :  { %680 = vsyncpa [#allocation5], 1 }

</bundles_post_ra>
